<compile_context>
chip_gen: v7x
topology: tpu7x:2x2x1
jax: 0.10.0
libtpu: 0.0.40
codegen_flags: <defaults>
</compile_context>

<pallas_src>
import math
import functools

import jax
import jax.numpy as jnp
from jax import lax
from jax.experimental import pallas as pl
from jax.experimental.pallas import tpu as pltpu


# Tile targets; shrunk automatically for small / awkward dims.
_TM, _TN, _TK = 512, 512, 1024
_MXU_DTYPE = jnp.bfloat16   # MXU operand / weight streaming dtype (f32 accumulate)


# ----------------------------------------------------------------------------
# Tile selection helpers
# ----------------------------------------------------------------------------
def _round_up(v, m):
    return (v + m - 1) // m * m


def _fit_tile(dim, target, align):
    """Largest align-multiple tile <= target, keeping grid padding waste <~25%."""
    dim_a = _round_up(dim, align)
    if dim_a <= target:
        return dim_a                       # one block covers the (aligned) dim
    t = target
    while t > align and _round_up(dim_a, t) - dim_a > dim_a // 4:
        t = _round_up(t // 2, align)
    return t


def _weight_tiles(in_f, out_f):
    tk = _fit_tile(in_f, _TK, 128)
    tn = _fit_tile(out_f, _TN, 128)
    # v7x megacore: keep >= 2 blocks along the parallel N axis when out_f allows,
    # so a small-batch call still feeds both TensorCores.
    while tn > 128 and _round_up(out_f, tn) // tn < 2:
        tn = _round_up(tn // 2, 128)
    return tn, tk


def _vmem_limit_bytes(tm, tn, tk, N_p, K_p, x_bytes, w_bytes, out_bytes, n_w_streams):
    est = (2 * tm * tk * x_bytes                    # x, double-buffered
           + 2 * n_w_streams * tn * tk * w_bytes    # wmu (+wsig), double-buffered
           + 2 * tm * tn * out_bytes                # output, double-buffered
           + tm * tn * 4                            # f32 accumulator scratch
           + (N_p * 128 + K_p + N_p) * 4)           # resident eps/bias (eo lane-padded)
    # 2x headroom for internal scratch; cap at 48 MiB (fits v7x's 64 MiB physical).
    return int(min(max(2 * est, 32 * 1024 * 1024), 48 * 1024 * 1024))


# ----------------------------------------------------------------------------
# Kernels
# ----------------------------------------------------------------------------
def _noisy_linear_train_kernel(x_ref, wmu_ref, wsig_ref, eo_ref, ei_ref, b_ref,
                               o_ref, acc_ref):
    j = pl.program_id(1)
    k = pl.program_id(2)

    # Rank-1 factorized noise rebuilt in-kernel from VMEM-resident vectors.
    # eps[n, c] = eps_out[n] * eps_in[c]; (tn,1)*(1,tk) VPU broadcast -> (tn,tk).
    eo = eo_ref[j]                                   # (tn, 1)  f32
    ei = ei_ref[k]                                   # (1, tk)  f32
    w = (wmu_ref[...].astype(jnp.float32)
         + wsig_ref[...].astype(jnp.float32) * (eo * ei))

    # y[m, n] = sum_c x[m, c] * w[n, c]: contract last dims of both operands
    # (MXU-native x @ W.T form, no XLU transpose). bf16 operands, f32 accumulate.
    partial = lax.dot_general(
        x_ref[...].astype(_MXU_DTYPE), w.astype(_MXU_DTYPE),
        dimension_numbers=(((1,), (1,)), ((), ())),
        preferred_element_type=jnp.float32)

    @pl.when(k == 0)
    def _():
        acc_ref[...] = partial          # direct store: no zero-fill + add

    @pl.when(k > 0)
    def _():
        acc_ref[...] += partial

    @pl.when(k == pl.num_programs(2) - 1)
    def _():
        o_ref[...] = (acc_ref[...] + b_ref[j]).astype(o_ref.dtype)


def _noisy_linear_eval_kernel(x_ref, wmu_ref, b_ref, o_ref, acc_ref):
    j = pl.program_id(1)
    k = pl.program_id(2)

    partial = lax.dot_general(
        x_ref[...].astype(_MXU_DTYPE), wmu_ref[...].astype(_MXU_DTYPE),
        dimension_numbers=(((1,), (1,)), ((), ())),
        preferred_element_type=jnp.float32)

    @pl.when(k == 0)
    def _():
        acc_ref[...] = partial

    @pl.when(k > 0)
    def _():
        acc_ref[...] += partial

    @pl.when(k == pl.num_programs(2) - 1)
    def _():
        o_ref[...] = (acc_ref[...] + b_ref[j]).astype(o_ref.dtype)


# ----------------------------------------------------------------------------
# One-time parameter preparation (hoists padding / bf16 cast / bias fold out of
# the per-forward path; call once per reset_noise / parameter update).
# ----------------------------------------------------------------------------
def prepare_noisy_linear(weight_mu, weight_sigma, weight_eps_out, weight_eps_in,
                         bias_mu, bias_sigma, bias_epsilon):
    out_f, in_f = weight_mu.shape
    tn, tk = _weight_tiles(in_f, out_f)
    N_p = _round_up(out_f, tn)
    K_p = _round_up(in_f, tk)
    pad2 = ((0, N_p - out_f), (0, K_p - in_f))
    f32 = jnp.float32

    wmu_p = jnp.pad(weight_mu.astype(f32), pad2).astype(_MXU_DTYPE)
    wsig_p = jnp.pad(weight_sigma.astype(f32), pad2).astype(_MXU_DTYPE)
    # Padded sigma / eps entries are zero, so padded K columns contribute nothing.
    eo_p = jnp.pad(weight_eps_out.astype(f32), (0, N_p - out_f)).reshape(N_p // tn, tn, 1)
    ei_p = jnp.pad(weight_eps_in.astype(f32), (0, K_p - in_f)).reshape(K_p // tk, 1, tk)
    b_train = jnp.pad((bias_mu + bias_sigma * bias_epsilon).astype(f32),
                      (0, N_p - out_f)).reshape(N_p // tn, 1, tn)
    b_eval = jnp.pad(bias_mu.astype(f32), (0, N_p - out_f)).reshape(N_p // tn, 1, tn)

    return dict(out_f=out_f, in_f=in_f, wmu=wmu_p, wsig=wsig_p, eo=eo_p, ei=ei_p,
                bias_train=b_train, bias_eval=b_eval)


# ----------------------------------------------------------------------------
# pallas_call wrappers
# ----------------------------------------------------------------------------
@functools.partial(jax.jit, static_argnames=("out_f",))
def _noisy_linear_train(x, wmu, wsig, eo, ei, bias, *, out_f):
    B, in_f = x.shape
    N_p, K_p = wmu.shape
    tn, tk = _weight_tiles(in_f, out_f)
    tm = _fit_tile(B, _TM, 8)
    B_p = _round_up(B, tm)
    xp = jnp.pad(x, ((0, B_p - B), (0, K_p - in_f)))     # only x is padded per call
    grid = (B_p // tm, N_p // tn, K_p // tk)

    out = pl.pallas_call(
        _noisy_linear_train_kernel,
        out_shape=jax.ShapeDtypeStruct((B_p, N_p), x.dtype),
        grid_spec=pltpu.PrefetchScalarGridSpec(
            num_scalar_prefetch=0,
            grid=grid,
            in_specs=[
                pl.BlockSpec((tm, tk), lambda i, j, k: (i, k)),               # x
                pl.BlockSpec((tn, tk), lambda i, j, k: (j, k)),               # weight_mu (bf16)
                pl.BlockSpec((tn, tk), lambda i, j, k: (j, k)),               # weight_sigma (bf16)
                pl.BlockSpec((N_p // tn, tn, 1), lambda i, j, k: (0, 0, 0)),  # eps_out (resident)
                pl.BlockSpec((K_p // tk, 1, tk), lambda i, j, k: (0, 0, 0)),  # eps_in  (resident)
                pl.BlockSpec((N_p // tn, 1, tn), lambda i, j, k: (0, 0, 0)),  # bias    (resident)
            ],
            out_specs=pl.BlockSpec((tm, tn), lambda i, j, k: (i, j)),
            scratch_shapes=[pltpu.VMEM((tm, tn), jnp.float32)]),
        compiler_params=pltpu.CompilerParams(
            dimension_semantics=("parallel", "parallel", "arbitrary"),
            vmem_limit_bytes=_vmem_limit_bytes(
                tm, tn, tk, N_p, K_p,
                xp.dtype.itemsize, wmu.dtype.itemsize, x.dtype.itemsize, 2)),
    )(xp, wmu, wsig, eo, ei, bias)
    return out[:B, :out_f]


@functools.partial(jax.jit, static_argnames=("out_f",))
def _noisy_linear_eval(x, wmu, bias, *, out_f):
    B, in_f = x.shape
    N_p, K_p = wmu.shape
    tn, tk = _weight_tiles(in_f, out_f)
    tm = _fit_tile(B, _TM, 8)
    B_p = _round_up(B, tm)
    xp = jnp.pad(x, ((0, B_p - B), (0, K_p - in_f)))
    grid = (B_p // tm, N_p // tn, K_p // tk)

    out = pl.pallas_call(
        _noisy_linear_eval_kernel,
        out_shape=jax.ShapeDtypeStruct((B_p, N_p), x.dtype),
        grid_spec=pltpu.PrefetchScalarGridSpec(
            num_scalar_prefetch=0,
            grid=grid,
            in_specs=[
                pl.BlockSpec((tm, tk), lambda i, j, k: (i, k)),               # x
                pl.BlockSpec((tn, tk), lambda i, j, k: (j, k)),               # weight_mu (bf16)
                pl.BlockSpec((N_p // tn, 1, tn), lambda i, j, k: (0, 0, 0)),  # bias (resident)
            ],
            out_specs=pl.BlockSpec((tm, tn), lambda i, j, k: (i, j)),
            scratch_shapes=[pltpu.VMEM((tm, tn), jnp.float32)]),
        compiler_params=pltpu.CompilerParams(
            dimension_semantics=("parallel", "parallel", "arbitrary"),
            vmem_limit_bytes=_vmem_limit_bytes(
                tm, tn, tk, N_p, K_p,
                xp.dtype.itemsize, wmu.dtype.itemsize, x.dtype.itemsize, 1)),
    )(xp, wmu, bias)
    return out[:B, :out_f]


def noisy_linear(x, prepared, *, training=True):
    """NoisyLinear forward. `prepared` comes from prepare_noisy_linear()."""
    if training:
        return _noisy_linear_train(x, prepared["wmu"], prepared["wsig"],
                                   prepared["eo"], prepared["ei"],
                                   prepared["bias_train"], out_f=prepared["out_f"])
    return _noisy_linear_eval(x, prepared["wmu"], prepared["bias_eval"],
                              out_f=prepared["out_f"])


# ----------------------------------------------------------------------------
# Parameter / noise initialization mirroring the torch module
# ----------------------------------------------------------------------------
def _scale_noise(key, size):
    """f(x) = sign(x) * sqrt(|x|) on standard-normal samples (factorized noise)."""
    x = jax.random.normal(key, (size,), dtype=jnp.float32)
    return jnp.sign(x) * jnp.sqrt(jnp.abs(x))


def init_noisy_linear_params(key, in_f, out_f, std_init=0.4):
    k_wmu, k_bmu, k_ein, k_eout, k_beps = jax.random.split(key, 5)
    mu_range = 1.0 / math.sqrt(in_f)

    weight_mu = jax.random.uniform(
        k_wmu, (out_f, in_f), minval=-mu_range, maxval=mu_range, dtype=jnp.float32)
    weight_sigma = jnp.full((out_f, in_f), std_init / math.sqrt(in_f), jnp.float32)
    bias_mu = jax.random.uniform(
        k_bmu, (out_f,), minval=-mu_range, maxval=mu_range, dtype=jnp.float32)
    bias_sigma = jnp.full((out_f,), std_init / math.sqrt(out_f), jnp.float32)

    eps_in = _scale_noise(k_ein, in_f)
    eps_out = _scale_noise(k_eout, out_f)
    weight_epsilon = jnp.outer(eps_out, eps_in)          # eps_out.ger(eps_in)
    bias_epsilon = _scale_noise(k_beps, out_f)

    return dict(weight_mu=weight_mu, weight_sigma=weight_sigma,
                weight_eps_out=eps_out, weight_eps_in=eps_in,
                weight_epsilon=weight_epsilon,
                bias_mu=bias_mu, bias_sigma=bias_sigma, bias_epsilon=bias_epsilon)


if __name__ == "__main__":
    key = jax.random.PRNGKey(0)
    k_params, k_x = jax.random.split(key)

    B, in_f, out_f = 8, 32, 64
    params = init_noisy_linear_params(k_params, in_f, out_f, std_init=0.4)
    x = jax.random.normal(k_x, (B, in_f), dtype=jnp.float32)

    prepared = prepare_noisy_linear(
        params["weight_mu"], params["weight_sigma"],
        params["weight_eps_out"], params["weight_eps_in"],
        params["bias_mu"], params["bias_sigma"], params["bias_epsilon"])

    # ---- training mode ----
    out = jax.block_until_ready(noisy_linear(x, prepared, training=True))
    assert out.shape == (B, out_f)

    b_train = params["bias_mu"] + params["bias_sigma"] * params["bias_epsilon"]

    # Tight reference with the same bf16 operand rounding as the kernel.
    wmu_b = params["weight_mu"].astype(jnp.bfloat16).astype(jnp.float32)
    wsig_b = params["weight_sigma"].astype(jnp.bfloat16).astype(jnp.float32)
    w_bf16 = (wmu_b + wsig_b * params["weight_epsilon"]).astype(jnp.bfloat16).astype(jnp.float32)
    x_b = x.astype(jnp.bfloat16).astype(jnp.float32)
    ref_tight = x_b @ w_bf16.T + b_train
    assert jnp.allclose(out, ref_tight, atol=1e-4, rtol=1e-4)

    # Loose check against the exact f32 torch-equivalent forward (bf16 MXU operands).
    w_f32 = params["weight_mu"] + params["weight_sigma"] * params["weight_epsilon"]
    ref_f32 = x @ w_f32.T + b_train
    assert jnp.allclose(out, ref_f32, atol=7e-2, rtol=7e-2)

    # ---- eval mode (mu-only path) ----
    out_eval = jax.block_until_ready(noisy_linear(x, prepared, training=False))
    ref_eval_tight = x_b @ wmu_b.T + params["bias_mu"]
    ref_eval_f32 = x @ params["weight_mu"].T + params["bias_mu"]
    assert out_eval.shape == (B, out_f)
    assert jnp.allclose(out_eval, ref_eval_tight, atol=1e-4, rtol=1e-4)
    assert jnp.allclose(out_eval, ref_eval_f32, atol=7e-2, rtol=7e-2)

    print("KERNEL_OK")
</pallas_src>

<mosaic_0001>
module attributes {stable_mosaic.version = 11 : i64} {
  func.func @_noisy_linear_train_kernel(%arg0: i32, %arg1: i32, %arg2: i32, %arg3: memref<8x128xf32, #tpu.memory_space<vmem>>, %arg4: memref<128x128xbf16, #tpu.memory_space<vmem>>, %arg5: memref<128x128xbf16, #tpu.memory_space<vmem>>, %arg6: memref<1x128x1xf32, #tpu.memory_space<vmem>>, %arg7: memref<1x1x128xf32, #tpu.memory_space<vmem>>, %arg8: memref<1x1x128xf32, #tpu.memory_space<vmem>>, %arg9: memref<8x128xf32, #tpu.memory_space<vmem>>, %arg10: memref<8x128xf32, #tpu.memory_space<vmem>>) attributes {dimension_semantics = [#tpu.dimension_semantics<parallel>, #tpu.dimension_semantics<parallel>, #tpu.dimension_semantics<arbitrary>], iteration_bounds = array<i64: 1, 1, 1>, scalar_prefetch = 0 : i64, scratch_operands = 1 : i64, tpu.core_type = #tpu.core_type<tc>, window_params = [{transform_indices = @transform_0, window_bounds = array<i64: 8, 128>}, {transform_indices = @transform_1, window_bounds = array<i64: 128, 128>}, {transform_indices = @transform_2, window_bounds = array<i64: 128, 128>}, {pipeline_mode = #tpu.pipeline_mode<synchronous>, transform_indices = @transform_3, window_bounds = array<i64: 1, 128, 1>}, {pipeline_mode = #tpu.pipeline_mode<synchronous>, transform_indices = @transform_4, window_bounds = array<i64: 1, 1, 128>}, {pipeline_mode = #tpu.pipeline_mode<synchronous>, transform_indices = @transform_5, window_bounds = array<i64: 1, 1, 128>}, {transform_indices = @transform_6, window_bounds = array<i64: 8, 128>}]} {
    %0 = arith.index_cast %arg1 : i32 to index
    %c0 = arith.constant 0 : index
    %c0_0 = arith.constant 0 : index
    %1 = vector.load %arg6[%0, %c0, %c0_0] : memref<1x128x1xf32, #tpu.memory_space<vmem>>, vector<1x128x1xf32>
    %2 = vector.shape_cast %1 : vector<1x128x1xf32> to vector<128x1xf32>
    %3 = arith.index_cast %arg2 : i32 to index
    %c0_1 = arith.constant 0 : index
    %c0_2 = arith.constant 0 : index
    %4 = vector.load %arg7[%3, %c0_1, %c0_2] : memref<1x1x128xf32, #tpu.memory_space<vmem>>, vector<1x1x128xf32>
    %5 = vector.shape_cast %4 : vector<1x1x128xf32> to vector<1x128xf32>
    %c0_3 = arith.constant 0 : index
    %c0_4 = arith.constant 0 : index
    %6 = vector.load %arg4[%c0_3, %c0_4] : memref<128x128xbf16, #tpu.memory_space<vmem>>, vector<128x128xbf16>
    %7 = arith.extf %6 : vector<128x128xbf16> to vector<128x128xf32>
    %c0_5 = arith.constant 0 : index
    %c0_6 = arith.constant 0 : index
    %8 = vector.load %arg5[%c0_5, %c0_6] : memref<128x128xbf16, #tpu.memory_space<vmem>>, vector<128x128xbf16>
    %9 = arith.extf %8 : vector<128x128xbf16> to vector<128x128xf32>
    %10 = vector.broadcast %2 : vector<128x1xf32> to vector<128x128xf32>
    %11 = vector.broadcast %5 : vector<1x128xf32> to vector<128x128xf32>
    %12 = arith.mulf %10, %11 : vector<128x128xf32>
    %13 = arith.mulf %9, %12 : vector<128x128xf32>
    %14 = arith.addf %7, %13 : vector<128x128xf32>
    %c0_7 = arith.constant 0 : index
    %c0_8 = arith.constant 0 : index
    %15 = vector.load %arg3[%c0_7, %c0_8] : memref<8x128xf32, #tpu.memory_space<vmem>>, vector<8x128xf32>
    %16 = arith.truncf %15 : vector<8x128xf32> to vector<8x128xbf16>
    %17 = arith.truncf %14 : vector<128x128xf32> to vector<128x128xbf16>
    %cst = arith.constant dense<0.000000e+00> : vector<8x128xf32>
    %18 = tpu.matmul %16, %17, %cst {dimension_numbers = #tpu.dot_dimension_numbers<[1], [1], [0], [0], [0, 0, 1, 0], [], []>} : vector<8x128xbf16>, vector<128x128xbf16>, vector<8x128xf32> -> vector<8x128xf32>
    %c0_i32 = arith.constant 0 : i32
    %19 = arith.cmpi eq, %arg2, %c0_i32 : i32
    %20 = arith.extui %19 : i1 to i32
    %c0_i32_9 = arith.constant 0 : i32
    %21 = arith.cmpi ne, %20, %c0_i32_9 : i32
    scf.if %21 {
      %c0_14 = arith.constant 0 : index
      %c0_15 = arith.constant 0 : index
      %28 = vector.load %arg10[%c0_14, %c0_15] : memref<8x128xf32, #tpu.memory_space<vmem>>, vector<8x128xf32>
      tpu.vector_store %arg10[%c0_14, %c0_15], %18 {strides = array<i32>} : memref<8x128xf32, #tpu.memory_space<vmem>>, vector<8x128xf32>,
    } else {
    }
    %c0_i32_10 = arith.constant 0 : i32
    %22 = arith.cmpi sgt, %arg2, %c0_i32_10 : i32
    %23 = arith.extui %22 : i1 to i32
    %c0_i32_11 = arith.constant 0 : i32
    %24 = arith.cmpi ne, %23, %c0_i32_11 : i32
    scf.if %24 {
      %c0_14 = arith.constant 0 : index
      %c0_15 = arith.constant 0 : index
      %28 = vector.load %arg10[%c0_14, %c0_15] : memref<8x128xf32, #tpu.memory_space<vmem>>, vector<8x128xf32>
      %29 = arith.addf %28, %18 : vector<8x128xf32>
      %c0_16 = arith.constant 0 : index
      %c0_17 = arith.constant 0 : index
      %30 = vector.load %arg10[%c0_16, %c0_17] : memref<8x128xf32, #tpu.memory_space<vmem>>, vector<8x128xf32>
      tpu.vector_store %arg10[%c0_16, %c0_17], %29 {strides = array<i32>} : memref<8x128xf32, #tpu.memory_space<vmem>>, vector<8x128xf32>,
    } else {
    }
    %c0_i32_12 = arith.constant 0 : i32
    %25 = arith.cmpi eq, %arg2, %c0_i32_12 : i32
    %26 = arith.extui %25 : i1 to i32
    %c0_i32_13 = arith.constant 0 : i32
    %27 = arith.cmpi ne, %26, %c0_i32_13 : i32
    scf.if %27 {
      %c0_14 = arith.constant 0 : index
      %c0_15 = arith.constant 0 : index
      %28 = vector.load %arg10[%c0_14, %c0_15] : memref<8x128xf32, #tpu.memory_space<vmem>>, vector<8x128xf32>
      %29 = arith.index_cast %arg1 : i32 to index
      %c0_16 = arith.constant 0 : index
      %c0_17 = arith.constant 0 : index
      %30 = vector.load %arg8[%29, %c0_16, %c0_17] : memref<1x1x128xf32, #tpu.memory_space<vmem>>, vector<1x1x128xf32>
      %31 = vector.shape_cast %30 : vector<1x1x128xf32> to vector<1x128xf32>
      %32 = vector.broadcast %31 : vector<1x128xf32> to vector<8x128xf32>
      %33 = arith.addf %28, %32 : vector<8x128xf32>
      %c0_18 = arith.constant 0 : index
      %c0_19 = arith.constant 0 : index
      %34 = vector.load %arg9[%c0_18, %c0_19] : memref<8x128xf32, #tpu.memory_space<vmem>>, vector<8x128xf32>
      tpu.vector_store %arg9[%c0_18, %c0_19], %33 {strides = array<i32>} : memref<8x128xf32, #tpu.memory_space<vmem>>, vector<8x128xf32>,
    } else {
    }
    return
  }
  func.func @transform_0(%arg0: i32, %arg1: i32, %arg2: i32) -> (i32, i32) {
    %c0_i32 = arith.constant 0 : i32
    return %arg0, %arg2 : i32, i32
  }
  func.func @transform_1(%arg0: i32, %arg1: i32, %arg2: i32) -> (i32, i32) {
    %c0_i32 = arith.constant 0 : i32
    return %arg1, %arg2 : i32, i32
  }
  func.func @transform_2(%arg0: i32, %arg1: i32, %arg2: i32) -> (i32, i32) {
    %c0_i32 = arith.constant 0 : i32
    return %arg1, %arg2 : i32, i32
  }
  func.func @transform_3(%arg0: i32, %arg1: i32, %arg2: i32) -> (i32, i32, i32) {
    %c0_i32 = arith.constant 0 : i32
    %c0_i32_0 = arith.constant 0 : i32
    %c0_i32_1 = arith.constant 0 : i32
    %c0_i32_2 = arith.constant 0 : i32
    return %c0_i32, %c0_i32_0, %c0_i32_1 : i32, i32, i32
  }
  func.func @transform_4(%arg0: i32, %arg1: i32, %arg2: i32) -> (i32, i32, i32) {
    %c0_i32 = arith.constant 0 : i32
    %c0_i32_0 = arith.constant 0 : i32
    %c0_i32_1 = arith.constant 0 : i32
    %c0_i32_2 = arith.constant 0 : i32
    return %c0_i32, %c0_i32_0, %c0_i32_1 : i32, i32, i32
  }
  func.func @transform_5(%arg0: i32, %arg1: i32, %arg2: i32) -> (i32, i32, i32) {
    %c0_i32 = arith.constant 0 : i32
    %c0_i32_0 = arith.constant 0 : i32
    %c0_i32_1 = arith.constant 0 : i32
    %c0_i32_2 = arith.constant 0 : i32
    return %c0_i32, %c0_i32_0, %c0_i32_1 : i32, i32, i32
  }
  func.func @transform_6(%arg0: i32, %arg1: i32, %arg2: i32) -> (i32, i32) {
    %c0_i32 = arith.constant 0 : i32
    return %arg0, %arg1 : i32, i32
  }
}

</mosaic_0001>

<bundles_post_ra>
// kernel: _noisy_linear_train.1
= control target key start
LH: loop header
LB: loop body
LE: loop exit
PB: predicated region body
PF: predicated region fallthrough
CT: control target
= control target key end

     0   :  { %v470_v2 = vmov 0   ;;  %s653_s0 = inlined_call_operand.vmem [shape: f32[8,128], index: 0, kind: input, shape index: {}]   ;;  %s654_s1 = inlined_call_operand.vmem [shape: bf16[128,128], index: 1, kind: input, shape index: {}]   ;;  %s655_s2 = inlined_call_operand.vmem [shape: bf16[128,128], index: 2, kind: input, shape index: {}]   ;;  %s656_s3 = inlined_call_operand.vmem [shape: f32[1,128,1], index: 3, kind: input, shape index: {}]   ;;  %s657_s4 = inlined_call_operand.vmem [shape: f32[1,1,128], index: 4, kind: input, shape index: {}]   ;;  %s658_s5 = inlined_call_operand.vmem [shape: f32[1,1,128], index: 5, kind: input, shape index: {}]   ;;  %s659_s6 = inlined_call_operand.hbm [shape: f32[8,128], index: 6, kind: output, shape index: {}]  }
   0x1   :  { %v29_v0 = vld [vmem:[%s656_s3 + $0x10] sm:$0xff]  ;;  %v27_v1 = vld [vmem:[%s656_s3] sm:$0xff]  ;;  %445 = vset.pattern.permute.xlu1 %v470_v2  ;;  %444 = vset.pattern.permute.xlu0 %v470_v2  ;;  %v30_v3 = vld [vmem:[%s656_s3 + $0x18] sm:$0xff] }
   0x2   :  { %120 = vperm.xlu1 %445, %v29_v0   ;;  %110 = vperm.xlu0 %444, %v27_v1   ;;  %v28_v4 = vld [vmem:[%s656_s3 + $0x8] sm:$0xff]  ;;  %v31_v6 = vld [vmem:[%s656_s3 + $0x20] sm:$0xff] }
   0x3   :  { %v32_v5 = vld [vmem:[%s656_s3 + $0x28] sm:$0xff] }
   0x6   :  { %125 = vperm.xlu1 %445, %v30_v3   ;;  %115 = vperm.xlu0 %444, %v28_v4  }
   0x7   :  { %11 = vsyncpa [#allocation4], 0  ;;  %v34_v7 = vld [vmem:[%s656_s3 + $0x38] sm:$0xff]  ;;  %v33_v8 = vld [vmem:[%s656_s3 + $0x30] sm:$0xff]  ;;  %v471_v9 = vmov 0.0   ;;  %vm472_vm0 = vmmov 0  }
   0x8   :  { %420 = vmatprep.subr.bf16.mxu0 %v471_v9  ;;  %v36_v10 = vld [vmem:[%s656_s3 + $0x48] sm:$0xff]  ;;  %v35_v11 = vld [vmem:[%s656_s3 + $0x40] sm:$0xff]  ;;  %v38_v12 = vld [vmem:[%s656_s3 + $0x58] sm:$0xff]  ;;  %436 = vmatprep.mubr.msk.bf16.mxu0 %vm472_vm0, %v471_v9  ;;  %s473_s13 = smov [#allocation3]  }
   0x9   :  { %v37_v13 = vld [vmem:[%s656_s3 + $0x50] sm:$0xff]  ;;  %v40_v14 = vld [vmem:[%s656_s3 + $0x68] sm:$0xff]  ;;  %v39_v15 = vld [vmem:[%s656_s3 + $0x60] sm:$0xff]  ;;  %s323_s14 = sshll.u32 %s473_s13, 4  ;;  %s324_s14 = int_to_ptr.vmem [resolvable:$true] %s323_s14 }
   0xa   :  { %135 = vperm.xlu1 %445, %v32_v5   ;;  %130 = vperm.xlu0 %444, %v31_v6   ;;  %v42_v16 = vld [vmem:[%s656_s3 + $0x78] sm:$0xff]  ;;  %v41_v17 = vld [vmem:[%s656_s3 + $0x70] sm:$0xff]  ;;  %v562_v18 = vld [vmem:[%s657_s4] ss:$0 sm:$0xff]  ;;  %s446_s15 = scalar_lea.vmem %s324_s14, 128  ;;  %p451_p1 = scmp.lt.s32.totalorder %s324_s14, %s324_s14 }
   0xb   :  { %v366_v19 = vld [vmem:[%s655_s2] sm:$0xff]   ;;  %v404_v25 = vld [vmem:[%s655_s2 + $0x8] sm:$0xff]   ;;  %v405_v45 = vld [vmem:[%s655_s2 + $0x10] sm:$0xff]   ;;  %p447_p0 = scmp.ne.s32.totalorder %s324_s14, %s446_s15  ;;  %p452_p2 = scmp.lt.s32.totalorder %s446_s15, %s446_s15 }
   0xc   :  { %v367_v22 = vunpack.c.l.bf16 %v366_v19  ;;  %v334_v24 = vld [vmem:[%s654_s1] sm:$0xff]   ;;  %v368_v26 = vunpack.c.h.bf16 %v366_v19  ;;  %v371_v32 = vunpack.c.l.bf16 %v404_v25  ;;  %v397_v34 = vld [vmem:[%s654_s1 + $0x8] sm:$0xff]   ;;  %v372_v36 = vunpack.c.h.bf16 %v404_v25  ;;  %v398_v53 = vld [vmem:[%s654_s1 + $0x10] sm:$0xff]  }
   0xd   :  { %v335_v30 = vunpack.c.l.bf16 %v334_v24  ;;  %v336_v31 = vunpack.c.h.bf16 %v334_v24  ;;  %v339_v41 = vunpack.c.l.bf16 %v397_v34  ;;  %v340_v43 = vunpack.c.h.bf16 %v397_v34  ;;  %v406_v60 = vld [vmem:[%s655_s2 + $0x18] sm:$0xff]   ;;  %p453_p3 = por %p452_p2, %p451_p1 }
   0xe   :  { %145 = vperm.xlu1 %445, %v34_v7   ;;  %140 = vperm.xlu0 %444, %v33_v8   ;;  %v376_v49 = vunpack.c.h.bf16 %v405_v45  ;;  %v375_v50 = vunpack.c.l.bf16 %v405_v45  ;;  %v344_v56 = vunpack.c.h.bf16 %v398_v53  ;;  %v343_v58 = vunpack.c.l.bf16 %v398_v53  ;;  %v399_v4 = vld [vmem:[%s654_s1 + $0x18] sm:$0xff]  }
   0xf   :  { %v380_v0 = vunpack.c.h.bf16 %v406_v60  ;;  %v379_v1 = vunpack.c.l.bf16 %v406_v60  ;;  %v348_v7 = vunpack.c.h.bf16 %v399_v4  ;;  %p454_p4 = pnand %p453_p3, %p447_p0 }
  0x12   :  { %155 = vperm.xlu1 %445, %v36_v10   ;;  %150 = vperm.xlu0 %444, %v35_v11   ;;  %v347_v10 = vunpack.c.l.bf16 %v399_v4 }
  0x16   :  { %165 = vperm.xlu1 %445, %v38_v12   ;;  %160 = vperm.xlu0 %444, %v37_v13   ;;  %v407_v12 = vld [vmem:[%s655_s2 + $0x20] sm:$0xff]  }
  0x1a   :  { %175 = vperm.xlu1 %445, %v40_v14   ;;  %170 = vperm.xlu0 %444, %v39_v15  }
  0x1e   :  { %185 = vperm.xlu1 %445, %v42_v16   ;;  %180 = vperm.xlu0 %444, %v41_v17   ;;  %v384_v16 = vunpack.c.h.bf16 %v407_v12  ;;  %v383_v17 = vunpack.c.l.bf16 %v407_v12 }
  0x81   :  { %v121_v20 = vpop.permute.xlu1 %120  ;;  %v111_v21 = vpop.permute.xlu0 %110 }
  0x82   :  { %v194_v23 = vmul.f32 %v562_v18, %v111_v21  ;;  %v196_v35 = vmul.f32 %v562_v18, %v121_v20  ;;  %v400_v21 = vld [vmem:[%s654_s1 + $0x20] sm:$0xff]  }
  0x83   :  { %v352_v24 = vunpack.c.h.bf16 %v400_v21 }
  0x84   :  { %v210_v28 = vmul.f32 %v367_v22, %v194_v23  ;;  %v212_v42 = vmul.f32 %v371_v32, %v196_v35 }
  0x85   :  { %v116_v27 = vpop.permute.xlu0 %115  ;;  %v126_v33 = vpop.permute.xlu1 %125 }
  0x86   :  { %v195_v29 = vmul.f32 %v562_v18, %v116_v27  ;;  %v197_v37 = vmul.f32 %v562_v18, %v126_v33  ;;  %v226_v39 = vadd.f32 %v335_v30, %v210_v28  ;;  %v228_v51 = vadd.f32 %v339_v41, %v212_v42  ;;  %v408_v28 = vld [vmem:[%s655_s2 + $0x28] sm:$0xff]  }
  0x87   :  { %v388_v32 = vunpack.c.h.bf16 %v408_v28  ;;  %v387_v33 = vunpack.c.l.bf16 %v408_v28 }
  0x88   :  { %v211_v38 = vmul.f32 %v368_v26, %v195_v29  ;;  %v213_v44 = vmul.f32 %v372_v36, %v197_v37  ;;  %v351_v26 = vunpack.c.l.bf16 %v400_v21  ;;  %v401_v36 = vld [vmem:[%s654_s1 + $0x28] sm:$0xff]  }
  0x89   :  { %v136_v47 = vpop.permute.xlu1 %135  ;;  %v131_v48 = vpop.permute.xlu0 %130  ;;  %v355_v41 = vunpack.c.l.bf16 %v401_v36 }
  0x8a   :  { %v227_v40 = vadd.f32 %v336_v31, %v211_v38  ;;  %v229_v52 = vadd.f32 %v340_v43, %v213_v44  ;;  %v199_v54 = vmul.f32 %v562_v18, %v136_v47  ;;  %v198_v55 = vmul.f32 %v562_v18, %v131_v48  ;;  %v409_v43 = vld [vmem:[%s655_s2 + $0x30] sm:$0xff]  }
  0x8b   :  { %v392_v47 = vunpack.c.h.bf16 %v409_v43  ;;  %v391_v48 = vunpack.c.l.bf16 %v409_v43 }
  0x8c   :  { %v244_v46 = vpack.c.bf16 %v227_v40, %v226_v39  ;;  %v215_v57 = vmul.f32 %v376_v49, %v199_v54  ;;  %v214_v59 = vmul.f32 %v375_v50, %v198_v55  ;;  %v245_v61 = vpack.c.bf16 %v229_v52, %v228_v51  ;;  %v402_v51 = vld [vmem:[%s654_s1 + $0x30] sm:$0xff]  }
  0x8d   :  { %v146_v62 = vpop.permute.xlu1 %145  ;;  %v141_v63 = vpop.permute.xlu0 %140  ;;  %v356_v39 = vunpack.c.h.bf16 %v401_v36  ;;  %v360_v54 = vunpack.c.h.bf16 %v402_v51 }
  0x8e   :  { %421 = vmatpush3.bf16.xpose.msra.mxu0 %v244_v46  ;;  %v231_v2 = vadd.f32 %v344_v56, %v215_v57  ;;  %v230_v3 = vadd.f32 %v343_v58, %v214_v59  ;;  %v201_v5 = vmul.f32 %v562_v18, %v146_v62  ;;  %v200_v6 = vmul.f32 %v562_v18, %v141_v63  ;;  %v410_v58 = vld [vmem:[%s655_s2 + $0x38] sm:$0xff]  }
  0x8f   :  { %422 = vmatprep.subr.bf16.mxu0 %v471_v9  ;;  %v359_v56 = vunpack.c.l.bf16 %v402_v51  ;;  %v396_v62 = vunpack.c.h.bf16 %v410_v58  ;;  %v395_v63 = vunpack.c.l.bf16 %v410_v58 }
  0x90   :  { %v217_v8 = vmul.f32 %v380_v0, %v201_v5  ;;  %v216_v11 = vmul.f32 %v379_v1, %v200_v6  ;;  %v246_v13 = vpack.c.bf16 %v231_v2, %v230_v3  ;;  %v403_v2 = vld [vmem:[%s654_s1 + $0x38] sm:$0xff]  }
  0x91   :  { %v156_v14 = vpop.permute.xlu1 %155  ;;  %v151_v15 = vpop.permute.xlu0 %150  ;;  %v364_v5 = vunpack.c.h.bf16 %v403_v2 }
  0x92   :  { %v233_v19 = vadd.f32 %v348_v7, %v217_v8  ;;  %v232_v20 = vadd.f32 %v347_v10, %v216_v11  ;;  %v203_v22 = vmul.f32 %v562_v18, %v156_v14  ;;  %v202_v23 = vmul.f32 %v562_v18, %v151_v15  ;;  %v242_v14 = vld [vmem:[%s653_s0] sm:$0xff] }
  0x93   :  { %v363_v7 = vunpack.c.l.bf16 %v403_v2  ;;  %v243_v15 = vpack.c.bf16 %v242_v14, %v242_v14 }
  0x94   :  { %v219_v25 = vmul.f32 %v384_v16, %v203_v22  ;;  %v218_v27 = vmul.f32 %v383_v17, %v202_v23  ;;  %v247_v29 = vpack.c.bf16 %v233_v19, %v232_v20 }
  0x95   :  { %v166_v30 = vpop.permute.xlu1 %165  ;;  %v161_v31 = vpop.permute.xlu0 %160 }
  0x96   :  { %423 = vmatpush3.bf16.xpose.msra.mxu0 %v245_v61  ;;  %v235_v34 = vadd.f32 %v352_v24, %v219_v25  ;;  %v234_v35 = vadd.f32 %v351_v26, %v218_v27  ;;  %v205_v37 = vmul.f32 %v562_v18, %v166_v30  ;;  %v204_v38 = vmul.f32 %v562_v18, %v161_v31 }
  0x97   :  { %424 = vmatprep.subr.bf16.mxu0 %v471_v9 }
  0x98   :  { %v221_v40 = vmul.f32 %v388_v32, %v205_v37  ;;  %v220_v42 = vmul.f32 %v387_v33, %v204_v38  ;;  %v248_v44 = vpack.c.bf16 %v235_v34, %v234_v35 }
  0x99   :  { %v176_v45 = vpop.permute.xlu1 %175  ;;  %v171_v46 = vpop.permute.xlu0 %170 }
  0x9a   :  { %v237_v49 = vadd.f32 %v356_v39, %v221_v40  ;;  %v236_v50 = vadd.f32 %v355_v41, %v220_v42  ;;  %v207_v52 = vmul.f32 %v562_v18, %v176_v45  ;;  %v206_v53 = vmul.f32 %v562_v18, %v171_v46 }
  0x9c   :  { %v223_v55 = vmul.f32 %v392_v47, %v207_v52  ;;  %v222_v57 = vmul.f32 %v391_v48, %v206_v53  ;;  %v249_v59 = vpack.c.bf16 %v237_v49, %v236_v50 }
  0x9d   :  { %v186_v60 = vpop.permute.xlu1 %185  ;;  %v181_v61 = vpop.permute.xlu0 %180 }
  0x9e   :  { %425 = vmatpush3.bf16.xpose.msra.mxu0 %v246_v13  ;;  %v239_v0 = vadd.f32 %v360_v54, %v223_v55  ;;  %v238_v1 = vadd.f32 %v359_v56, %v222_v57  ;;  %v209_v3 = vmul.f32 %v562_v18, %v186_v60  ;;  %v208_v4 = vmul.f32 %v562_v18, %v181_v61  ;;  %v332_v18 = vld [vmem:[%s658_s5] ss:$0 sm:$0xff] }
  0x9f   :  { %426 = vmatprep.subr.bf16.mxu0 %v471_v9 }
  0xa0   :  { %v225_v6 = vmul.f32 %v396_v62, %v209_v3  ;;  %v224_v8 = vmul.f32 %v395_v63, %v208_v4  ;;  %v250_v10 = vpack.c.bf16 %v239_v0, %v238_v1 }
  0xa2   :  { %v241_v11 = vadd.f32 %v364_v5, %v225_v6  ;;  %v240_v12 = vadd.f32 %v363_v7, %v224_v8 }
  0xa4   :  { %v251_v13 = vpack.c.bf16 %v241_v11, %v240_v12 }
  0xa6   :  { %427 = vmatpush3.bf16.xpose.msra.mxu0 %v247_v29 }
  0xa7   :  { %428 = vmatprep.subr.bf16.mxu0 %v471_v9 }
  0xae   :  { %429 = vmatpush3.bf16.xpose.msra.mxu0 %v248_v44 }
  0xaf   :  { %430 = vmatprep.subr.bf16.mxu0 %v471_v9 }
  0xb6   :  { %431 = vmatpush3.bf16.xpose.msra.mxu0 %v249_v59 }
  0xb7   :  { %432 = vmatprep.subr.bf16.mxu0 %v471_v9 }
  0xbe   :  { %433 = vmatpush3.bf16.xpose.msra.mxu0 %v250_v10 }
  0xbf   :  { %434 = vmatprep.subr.bf16.mxu0 %v471_v9 }
  0xc6   :  { %435 = vmatpush3.bf16.xpose.msra.mxu0 %v251_v13 }
  0xcd   :  { %437 = vmatmul.mubr.bf16.vlgmr.msra.gmra.mrb[0].mxu0 %v243_v15 }
 0x1a0   :  { %v286_v16 = vpop.f32.mrb[0].mxu0 }
 0x1a1   :  { %v315_v17 = vadd.f32 %v332_v18, %v286_v16  ;;  %v438_v19 = vpop.f32.mrb[1].mxu0 }
 0x1a2   :  { %v289_v9 = vpop.f32.mrb[2].mxu0 }
 0x1a3   :  { %316 = vst [vmem:[#allocation3] sm:$0xff] %v315_v17  ;;  %v439_v20 = vpop.f32.mrb[3].mxu0 }
 0x1a4   :  { %457 = shalt.err (!%p454_p4)
}
 0x1a5   :  { %s458_s5 = scalar_lea.hbm %s659_s6, 128 }
 0x1a6   :  { %p459_p5 = scmp.ne.s32.totalorder %s659_s6, %s458_s5  ;;  %p462_p6 = scmp.lt.u32.totalorder %s458_s5, %s659_s6 }
 0x1a8   :  { %p464_p7 = pnand %p462_p6, %p459_p5 }
 0x1aa   :  { %467 = shalt.err (!%p464_p7)
}
 0x1ab   :  { %326 = dma.vmem_to_hbm [thread:$0]  %s324_s14, 128, %s659_s6, [#allocation4]  }
 0x1ac   :  { %468 = dma.done.wait [#allocation4], 128  }
 0x1ad   :  { %469 = vsyncadd [#allocation4], 4294967168 }
 0x1ae   :  { %330 = vsyncpa [#allocation4], 1 }

</bundles_post_ra>
